<compile_context>
chip_gen: v5e
topology: v5e:2x2
jax: 0.10.0
libtpu: 0.0.40
codegen_flags: <defaults>
</compile_context>

<pallas_src>
import jax
import jax.numpy as jnp
from jax.experimental import pallas as pl
from jax.experimental.pallas import tpu as pltpu

NEG_SLOPE = 0.2


def _leaky_relu(v):
    return jnp.where(v > 0, v, NEG_SLOPE * v)


def zdisc_kernel(x_ref, w1_ref, w2_ref, p_ref, o_ref):
    # Packed small operands: row 0 = b1, row 1 = b2, row 2 = w3^T, row 3[0] = b3.
    b1 = p_ref[0:1, :]          # (1, d) f32
    b2 = p_ref[1:2, :]          # (1, d) f32
    w3 = p_ref[2:3, :]          # (1, d) f32
    b3 = p_ref[3:4, 0:1]        # (1, 1) f32

    # ---- linear1 + leaky_relu : (B, Z) @ (Z, d) + b1 -> (B, d) ----
    x_bf = x_ref[...].astype(jnp.bfloat16)
    h1 = jnp.dot(x_bf, w1_ref[...], preferred_element_type=jnp.float32) + b1
    h1 = _leaky_relu(h1).astype(jnp.bfloat16)                    # (B, d) bf16

    # ---- PyTorch .view(1, -1): lane-axis concat of the B bf16 rows ----
    B, d = h1.shape
    h1_flat = jnp.concatenate([h1[b:b + 1, :] for b in range(B)],
                              axis=1)                            # (1, B*d) bf16

    # ---- linear2 + leaky_relu : single (1, B*d) @ (B*d, d) MXU matmul ----
    h2 = jnp.dot(h1_flat, w2_ref[...],
                 preferred_element_type=jnp.float32) + b2
    h2 = _leaky_relu(h2)                                         # (1, d) f32

    # ---- linear3 on VPU/XLU (no N=1 MXU pass) + numerically stable sigmoid ----
    logit = jnp.sum(h2 * w3, axis=-1, keepdims=True) + b3        # (1, 1) f32
    e = jnp.exp(-jnp.abs(logit))                                 # in (0, 1], no overflow
    s = pl.reciprocal(1.0 + e, approx=True)
    # TODO(synk): a (1,1) VMEM output still costs a masked vst + padded tile
    # writeback; an SMEM-space scalar output would shave the epilogue further.
    o_ref[...] = jnp.where(logit >= 0.0, s, 1.0 - s)


def prepare_params(w1, b1, w2, b2, w3, b3):
    """One-time (init) conversion: bf16 weights + packed small operands."""
    d = w1.shape[1]
    packed = jnp.zeros((4, d), dtype=jnp.float32)
    packed = packed.at[0, :].set(b1.astype(jnp.float32))
    packed = packed.at[1, :].set(b2.astype(jnp.float32))
    packed = packed.at[2, :].set(w3.reshape(-1).astype(jnp.float32))
    packed = packed.at[3, 0].set(b3.reshape(-1)[0].astype(jnp.float32))
    return (w1.astype(jnp.bfloat16),          # (Z, d)
            w2.astype(jnp.bfloat16),          # (B*d, d)
            packed)                           # (4, d)


@jax.jit
def zdiscriminator_mergebatch(x, w1_bf, w2_bf, packed):
    """x: (B, z_size) f32; w1_bf/w2_bf pre-converted bf16; packed (4, d) f32."""
    B, Z = x.shape
    d = w1_bf.shape[1]

    flops = 2 * (B * Z * d + (B * d) * d + d)
    bytes_accessed = (x.size * 4 + w1_bf.size * 2 + w2_bf.size * 2
                      + packed.size * 4 + 4)
    cost = pl.CostEstimate(flops=flops, transcendentals=2,
                           bytes_accessed=bytes_accessed)

    vmem = pl.BlockSpec(memory_space=pltpu.MemorySpace.VMEM)

    # TODO(synk): if several independent discriminator evaluations are available
    # at a call site, batch them behind a leading "parallel" grid axis (weights
    # as grid-invariant blocks) to amortize launch/DMA overhead and use both
    # TensorCores on v7x; a single forward pass has no such axis.
    return pl.pallas_call(
        zdisc_kernel,
        out_shape=jax.ShapeDtypeStruct((1, 1), jnp.float32),
        in_specs=[vmem, vmem, vmem, vmem],
        out_specs=vmem,
        cost_estimate=cost,
    )(x, w1_bf, w2_bf, packed)


def reference_forward(x, w1, b1, w2, b2, w3, b3):
    h1 = jax.nn.leaky_relu(x @ w1 + b1, NEG_SLOPE).reshape(1, -1)
    h2 = jax.nn.leaky_relu(h1 @ w2 + b2, NEG_SLOPE)
    return jax.nn.sigmoid(h2 @ w3 + b3)


if __name__ == "__main__":
    # Small shapes consistent with the module: z_size=32, batchSize=4, d=128.
    z_size, batch_size, d = 32, 4, 128

    key = jax.random.PRNGKey(0)
    kx, k1, k2, k3 = jax.random.split(key, 4)

    x = jax.random.normal(kx, (batch_size, z_size), dtype=jnp.float32)

    # Deterministic "normal_init(mean=0, std=0.02)"-style weights, zero biases.
    w1 = 0.02 * jax.random.normal(k1, (z_size, d), dtype=jnp.float32)
    b1 = jnp.zeros((d,), dtype=jnp.float32)
    w2 = 0.02 * jax.random.normal(k2, (d * batch_size, d), dtype=jnp.float32)
    b2 = jnp.zeros((d,), dtype=jnp.float32)
    w3 = 0.02 * jax.random.normal(k3, (d, 1), dtype=jnp.float32)
    b3 = jnp.zeros((1,), dtype=jnp.float32)

    # One-time init-style conversion (outside the hot path).
    params = prepare_params(w1, b1, w2, b2, w3, b3)

    out = zdiscriminator_mergebatch(x, *params)
    out = jax.block_until_ready(out)

    ref = reference_forward(x, w1, b1, w2, b2, w3, b3)
    assert out.shape == (1, 1), out.shape
    # bf16 MXU operands + approx-reciprocal sigmoid => relaxed tolerance.
    assert jnp.allclose(out, ref, atol=3e-3, rtol=3e-3), (out, ref)

    print("KERNEL_OK")
</pallas_src>

<mosaic_0001>
module attributes {stable_mosaic.version = 11 : i64} {
  func.func @zdisc_kernel(%arg0: memref<4x32xf32, #tpu.memory_space<vmem>>, %arg1: memref<32x128xbf16, #tpu.memory_space<vmem>>, %arg2: memref<512x128xbf16, #tpu.memory_space<vmem>>, %arg3: memref<4x128xf32, #tpu.memory_space<vmem>>, %arg4: memref<1x1xf32, #tpu.memory_space<vmem>>) attributes {dimension_semantics = [], scalar_prefetch = 0 : i64, scratch_operands = 0 : i64, tpu.core_type = #tpu.core_type<tc>} {
    %c0 = arith.constant 0 : index
    %c0_0 = arith.constant 0 : index
    %0 = vector.load %arg3[%c0, %c0_0] : memref<4x128xf32, #tpu.memory_space<vmem>>, vector<1x128xf32>
    %c1 = arith.constant 1 : index
    %c0_1 = arith.constant 0 : index
    %1 = vector.load %arg3[%c1, %c0_1] : memref<4x128xf32, #tpu.memory_space<vmem>>, vector<1x128xf32>
    %c2 = arith.constant 2 : index
    %c0_2 = arith.constant 0 : index
    %2 = vector.load %arg3[%c2, %c0_2] : memref<4x128xf32, #tpu.memory_space<vmem>>, vector<1x128xf32>
    %c3 = arith.constant 3 : index
    %c0_3 = arith.constant 0 : index
    %3 = vector.load %arg3[%c3, %c0_3] : memref<4x128xf32, #tpu.memory_space<vmem>>, vector<1x1xf32>
    %c0_4 = arith.constant 0 : index
    %c0_5 = arith.constant 0 : index
    %4 = vector.load %arg0[%c0_4, %c0_5] : memref<4x32xf32, #tpu.memory_space<vmem>>, vector<4x32xf32>
    %5 = arith.truncf %4 : vector<4x32xf32> to vector<4x32xbf16>
    %c0_6 = arith.constant 0 : index
    %c0_7 = arith.constant 0 : index
    %6 = vector.load %arg1[%c0_6, %c0_7] : memref<32x128xbf16, #tpu.memory_space<vmem>>, vector<32x128xbf16>
    %cst = arith.constant dense<0.000000e+00> : vector<4x128xf32>
    %7 = tpu.matmul %5, %6, %cst {dimension_numbers = #tpu.dot_dimension_numbers<[1], [0], [0], [1], [0, 0, 1, 1], [], []>} : vector<4x32xbf16>, vector<32x128xbf16>, vector<4x128xf32> -> vector<4x128xf32>
    %8 = vector.broadcast %0 : vector<1x128xf32> to vector<4x128xf32>
    %9 = arith.addf %7, %8 : vector<4x128xf32>
    %cst_8 = arith.constant 0.000000e+00 : f32
    %10 = vector.broadcast %cst_8 : f32 to vector<4x128xf32>
    %11 = arith.cmpf ogt, %9, %10 : vector<4x128xf32>
    %cst_9 = arith.constant 2.000000e-01 : f32
    %12 = vector.broadcast %cst_9 : f32 to vector<4x128xf32>
    %13 = arith.mulf %12, %9 : vector<4x128xf32>
    %14 = arith.select %11, %9, %13 : vector<4x128xi1>, vector<4x128xf32>
    %15 = arith.truncf %14 : vector<4x128xf32> to vector<4x128xbf16>
    %16 = vector.extract_strided_slice %15 {offsets = [0, 0], sizes = [1, 128], strides = [1, 1]} : vector<4x128xbf16> to vector<1x128xbf16>
    %17 = vector.extract_strided_slice %15 {offsets = [1, 0], sizes = [1, 128], strides = [1, 1]} : vector<4x128xbf16> to vector<1x128xbf16>
    %18 = vector.extract_strided_slice %15 {offsets = [2, 0], sizes = [1, 128], strides = [1, 1]} : vector<4x128xbf16> to vector<1x128xbf16>
    %19 = vector.extract_strided_slice %15 {offsets = [3, 0], sizes = [1, 128], strides = [1, 1]} : vector<4x128xbf16> to vector<1x128xbf16>
    %20 = tpu.concatenate %16, %17, %18, %19 in 1 : vector<1x128xbf16>, vector<1x128xbf16>, vector<1x128xbf16>, vector<1x128xbf16> -> vector<1x512xbf16>
    %c0_10 = arith.constant 0 : index
    %c0_11 = arith.constant 0 : index
    %21 = vector.load %arg2[%c0_10, %c0_11] : memref<512x128xbf16, #tpu.memory_space<vmem>>, vector<512x128xbf16>
    %cst_12 = arith.constant dense<0.000000e+00> : vector<1x128xf32>
    %22 = tpu.matmul %20, %21, %cst_12 {dimension_numbers = #tpu.dot_dimension_numbers<[1], [0], [0], [1], [0, 0, 1, 1], [], []>} : vector<1x512xbf16>, vector<512x128xbf16>, vector<1x128xf32> -> vector<1x128xf32>
    %23 = arith.addf %22, %1 : vector<1x128xf32>
    %cst_13 = arith.constant 0.000000e+00 : f32
    %24 = vector.broadcast %cst_13 : f32 to vector<1x128xf32>
    %25 = arith.cmpf ogt, %23, %24 : vector<1x128xf32>
    %cst_14 = arith.constant 2.000000e-01 : f32
    %26 = vector.broadcast %cst_14 : f32 to vector<1x128xf32>
    %27 = arith.mulf %26, %23 : vector<1x128xf32>
    %28 = arith.select %25, %23, %27 : vector<1x128xi1>, vector<1x128xf32>
    %29 = arith.mulf %28, %2 : vector<1x128xf32>
    %cst_15 = arith.constant dense<0.000000e+00> : vector<1xf32>
    %30 = vector.multi_reduction <add>, %29, %cst_15 [1] : vector<1x128xf32> to vector<1xf32>
    %31 = vector.shape_cast %30 : vector<1xf32> to vector<1x1xf32>
    %32 = arith.addf %31, %3 : vector<1x1xf32>
    %33 = math.absf %32 : vector<1x1xf32>
    %cst_16 = arith.constant 0.000000e+00 : f32
    %34 = vector.broadcast %cst_16 : f32 to vector<1x1xf32>
    %35 = arith.subf %34, %33 : vector<1x1xf32>
    %36 = math.exp %35 : vector<1x1xf32>
    %cst_17 = arith.constant 1.000000e+00 : f32
    %37 = vector.broadcast %cst_17 : f32 to vector<1x1xf32>
    %38 = arith.addf %37, %36 : vector<1x1xf32>
    %39 = tpu.reciprocal %38 {approx = true} : vector<1x1xf32> -> vector<1x1xf32>
    %cst_18 = arith.constant 0.000000e+00 : f32
    %40 = vector.broadcast %cst_18 : f32 to vector<1x1xf32>
    %41 = arith.cmpf oge, %32, %40 : vector<1x1xf32>
    %cst_19 = arith.constant 1.000000e+00 : f32
    %42 = vector.broadcast %cst_19 : f32 to vector<1x1xf32>
    %43 = arith.subf %42, %39 : vector<1x1xf32>
    %44 = arith.select %41, %39, %43 : vector<1x1xi1>, vector<1x1xf32>
    %c0_20 = arith.constant 0 : index
    %c0_21 = arith.constant 0 : index
    %45 = vector.load %arg4[%c0_20, %c0_21] : memref<1x1xf32, #tpu.memory_space<vmem>>, vector<1x1xf32>
    tpu.vector_store %arg4[%c0_20, %c0_21], %44 {strides = array<i32>} : memref<1x1xf32, #tpu.memory_space<vmem>>, vector<1x1xf32>,
    return
  }
}

</mosaic_0001>

<bundles_post_ra>
// kernel: zdiscriminator_mergebatch.1
= control target key start
LH: loop header
LB: loop body
LE: loop exit
PB: predicated region body
PF: predicated region fallthrough
CT: control target
= control target key end

     0   :  { %9 = vsyncpa [#allocation3], 0  ;;  %s838_s0 = inlined_call_operand.hbm [shape: f32[4,32], index: 0, kind: input, shape index: {}]   ;;  %s839_s1 = inlined_call_operand.hbm [shape: bf16[32,128], index: 1, kind: input, shape index: {}]   ;;  %s840_s2 = inlined_call_operand.hbm [shape: bf16[512,128], index: 2, kind: input, shape index: {}]   ;;  %s841_s3 = inlined_call_operand.hbm [shape: f32[4,128], index: 3, kind: input, shape index: {}]   ;;  %s842_s4 = inlined_call_operand.hbm [shape: f32[1,1], index: 4, kind: output, shape index: {}]  }
   0x1   :  { %10 = vsyncpa [#allocation6], 0 }
   0x2   :  { %11 = vsyncpa [#allocation9], 0  ;;  %s28_s17 = sshll.u32 %s839_s1, 4  ;;  %s29_s17 = int_to_ptr.hbm [resolvable:$true] %s28_s17 }
   0x3   :  { %12 = vsyncpa [#allocation4], 0  ;;  %s791_s18 = smov [#allocation5]   ;;  %s18_s22 = sshll.u32 %s838_s0, 4  ;;  %s19_s22 = int_to_ptr.hbm [resolvable:$true] %s18_s22 }
   0x4   :  { %s30_s19 = sshll.u32 %s791_s18, 4  ;;  %s792_s23 = smov 64   ;;  %s31_s19 = int_to_ptr.vmem [resolvable:$true] %s30_s19 }
   0x5   :  { %s793_s24 = smov 4   ;;  %s794_s25 = smov [#allocation2]  }
   0x6   :  { %36 = dma.hbm_to_vmem [thread:$0]  %s29_s17, 256, %s31_s19, [#allocation6], %s792_s23, %s792_s23, %s793_s24  }
   0x7   :  { %s20_s26 = sshll.u32 %s794_s25, 4  ;;  %s41_s29 = sshll.u32 %s840_s2, 4  ;;  %s21_s26 = int_to_ptr.vmem [resolvable:$true] %s20_s26  ;;  %s42_s29 = int_to_ptr.hbm [resolvable:$true] %s41_s29 }
   0x8   :  { %23 = dma.hbm_to_vmem [thread:$0]  %s19_s22, 64, %s21_s26, [#allocation3]  }
   0x9   :  { %s55_s5 = sshll.u32 %s841_s3, 4  ;;  %s795_s6 = smov [#allocation7]   ;;  %s56_s5 = int_to_ptr.hbm [resolvable:$true] %s55_s5 }
   0xa   :  { %s43_s7 = sshll.u32 %s795_s6, 4  ;;  %s796_s0 = smov [#allocation8]   ;;  %s44_s7 = int_to_ptr.vmem [resolvable:$true] %s43_s7 }
   0xb   :  { %49 = dma.hbm_to_vmem [thread:$0]  %s42_s29, 4096, %s44_s7, [#allocation6], %s792_s23, %s792_s23, %s793_s24  }
   0xc   :  { %s57_s8 = sshll.u32 %s796_s0, 4  ;;  %s58_s8 = int_to_ptr.vmem [resolvable:$true] %s57_s8 }
   0xd   :  { %60 = dma.hbm_to_vmem [thread:$0]  %s56_s5, 64, %s58_s8, [#allocation9]  }
   0xe   :  { %783 = dma.done.wait [#allocation3], 64  }
   0xf   :  { %784 = vsyncadd [#allocation3], 4294967232 }
  0x10   :  { %785 = dma.done.wait [#allocation6], 4352  }
  0x11   :  { %786 = vsyncadd [#allocation6], 4294962944 }
  0x12   :  { %787 = dma.done.wait [#allocation9], 64  }
  0x13   :  { %788 = vsyncadd [#allocation9], 4294967232  ;;  %v618_v0 = vld [vmem:[#allocation5 + $0x8] sm:$0xff]  ;;  %v617_v3 = vld [vmem:[#allocation5] sm:$0xff]  ;;  %vm101_vm0 = vcmask 261120   ;;  %vm445_vm3 = vcmask 1040384  }
  0x14   :  { %v626_v1 = vld [vmem:[#allocation7 + $0x38] sm:$0xff]  ;;  %111 = vmatpush.bf16.msra.mxu0 %v618_v0  ;;  %v82_v4 = vld [vmem:[#allocation2] sm:$0xf]  ;;  %v625_v6 = vld [vmem:[#allocation7 + $0x30] sm:$0xff]  ;;  %s797_s2 = smov [#allocation10]   ;;  %s468_s11 = sshll.u32 %s842_s4, 4  ;;  %s469_s11 = int_to_ptr.hbm [resolvable:$true] %s468_s11 }
  0x15   :  { %v634_v2 = vld [vmem:[#allocation7 + $0x78] sm:$0xff]  ;;  %389 = vmatpush.bf16.msra.mxu1 %v626_v1  ;;  %v633_v8 = vld [vmem:[#allocation7 + $0x70] sm:$0xff]  ;;  %v83_v10 = vpack.c.bf16 %v82_v4, %v82_v4  ;;  %v624_v11 = vld [vmem:[#allocation7 + $0x28] sm:$0xff]  ;;  %s466_s3 = sshll.u32 %s797_s2, 4  ;;  %vm459_vm4 = vcmask 0   ;;  %s467_s3 = int_to_ptr.vmem [resolvable:$true] %s466_s3 }
  0x16   :  { %v642_v5 = vld [vmem:[#allocation7 + $0xb8] sm:$0xff]  ;;  %402 = vmatpush.bf16.msra.mxu2 %v634_v2  ;;  %v641_v9 = vld [vmem:[#allocation7 + $0xb0] sm:$0xff]  ;;  %v632_v13 = vld [vmem:[#allocation7 + $0x68] sm:$0xff] }
  0x17   :  { %v650_v7 = vld [vmem:[#allocation7 + $0xf8] sm:$0xff]  ;;  %415 = vmatpush.bf16.msra.mxu3 %v642_v5  ;;  %v649_v12 = vld [vmem:[#allocation7 + $0xf0] sm:$0xff]  ;;  %v640_v14 = vld [vmem:[#allocation7 + $0xa8] sm:$0xff] }
  0x18   :  { %112 = vmatpush.bf16.msra.mxu0 %v617_v3  ;;  %v623_v15 = vld [vmem:[#allocation7 + $0x20] sm:$0xff]  ;;  %v648_v16 = vld [vmem:[#allocation7 + $0xe8] sm:$0xff]  ;;  %v622_v19 = vld [vmem:[#allocation7 + $0x18] sm:$0xff] }
  0x19   :  { %390 = vmatpush.bf16.msra.mxu1 %v625_v6  ;;  %v631_v17 = vld [vmem:[#allocation7 + $0x60] sm:$0xff]  ;;  %v630_v21 = vld [vmem:[#allocation7 + $0x58] sm:$0xff]  ;;  %v621_v23 = vld [vmem:[#allocation7 + $0x10] sm:$0xff] }
  0x1a   :  { %403 = vmatpush.bf16.msra.mxu2 %v633_v8  ;;  %v639_v18 = vld [vmem:[#allocation7 + $0xa0] sm:$0xff]  ;;  %v638_v22 = vld [vmem:[#allocation7 + $0x98] sm:$0xff]  ;;  %v620_v24 = vld [vmem:[#allocation7 + $0x8] sm:$0xff] }
  0x1b   :  { %416 = vmatpush.bf16.msra.mxu3 %v641_v9  ;;  %488 = vmatmul.msk.bf16.vlgmr.msra.gmra.mxu0 %vm101_vm0, %v83_v10  ;;  %v647_v20 = vld [vmem:[#allocation7 + $0xe0] sm:$0xff]  ;;  %v646_v25 = vld [vmem:[#allocation7 + $0xd8] sm:$0xff]  ;;  %v629_v26 = vld [vmem:[#allocation7 + $0x50] sm:$0xff] }
  0x1c   :  { %428 = vmatpush.bf16.msrb.mxu0 %v650_v7  ;;  %v637_v27 = vld [vmem:[#allocation7 + $0x90] sm:$0xff]  ;;  %v619_v28 = vld [vmem:[#allocation7] sm:$0xff]  ;;  %v628_v30 = vld [vmem:[#allocation7 + $0x48] sm:$0xff] }
  0x1d   :  { %391 = vmatpush.bf16.msra.mxu1 %v624_v11  ;;  %v645_v29 = vld [vmem:[#allocation7 + $0xd0] sm:$0xff]  ;;  %v636_v31 = vld [vmem:[#allocation7 + $0x88] sm:$0xff]  ;;  %v627_v33 = vld [vmem:[#allocation7 + $0x40] sm:$0xff] }
  0x1e   :  { %404 = vmatpush.bf16.msra.mxu2 %v632_v13  ;;  %v644_v32 = vld [vmem:[#allocation7 + $0xc8] sm:$0xff]  ;;  %v635_v34 = vld [vmem:[#allocation7 + $0x80] sm:$0xff] }
  0x1f   :  { %417 = vmatpush.bf16.msra.mxu3 %v640_v14  ;;  %v643_v35 = vld [vmem:[#allocation7 + $0xc0] sm:$0xff] }
  0x20   :  { %429 = vmatpush.bf16.msrb.mxu0 %v649_v12  ;;  %v658_v36 = vld [vmem:[#allocation8] ss:$0 sm:$0xff]  ;;  %v79_v49 = vld [vmem:[#allocation8 + $0x1] sm:$0x1]  ;;  %v80_v60 = vld [vmem:[#allocation8 + $0x2] sm:$0x1] }
  0x21   :  { %392 = vmatpush.bf16.msra.mxu1 %v623_v15  ;;  %v81_v2 = vld [vmem:[#allocation8 + $0x3] sm:$0x1] }
  0x22   :  { %405 = vmatpush.bf16.msra.mxu2 %v631_v17 }
  0x23   :  { %418 = vmatpush.bf16.msra.mxu3 %v639_v18 }
  0x24   :  { %430 = vmatpush.bf16.msrb.mxu0 %v648_v16 }
  0x25   :  { %393 = vmatpush.bf16.msra.mxu1 %v622_v19 }
  0x26   :  { %406 = vmatpush.bf16.msra.mxu2 %v630_v21 }
  0x27   :  { %419 = vmatpush.bf16.msra.mxu3 %v638_v22 }
  0x28   :  { %431 = vmatpush.bf16.msrb.mxu0 %v647_v20 }
  0x29   :  { %394 = vmatpush.bf16.msra.mxu1 %v621_v23 }
  0x2a   :  { %407 = vmatpush.bf16.msra.mxu2 %v629_v26 }
  0x2b   :  { %420 = vmatpush.bf16.msra.mxu3 %v637_v27 }
  0x2c   :  { %432 = vmatpush.bf16.msrb.mxu0 %v646_v25 }
  0x2d   :  { %395 = vmatpush.bf16.msra.mxu1 %v620_v24 }
  0x2e   :  { %408 = vmatpush.bf16.msra.mxu2 %v628_v30 }
  0x2f   :  { %421 = vmatpush.bf16.msra.mxu3 %v636_v31 }
  0x30   :  { %433 = vmatpush.bf16.msrb.mxu0 %v645_v29 }
  0x31   :  { %396 = vmatpush.bf16.msra.mxu1 %v619_v28 }
  0x32   :  { %409 = vmatpush.bf16.msra.mxu2 %v627_v33 }
  0x33   :  { %422 = vmatpush.bf16.msra.mxu3 %v635_v34 }
  0x34   :  { %434 = vmatpush.bf16.msrb.mxu0 %v644_v32 }
  0x38   :  { %435 = vmatpush.bf16.msrb.mxu0 %v643_v35 }
  0x98   :  { %v114_v37 = vpop.f32.mrf.mxu0 }
  0x99   :  { %v115_v38 = vadd.f32 %v658_v36, %v114_v37 }
  0x9b   :  { %v119_v39 = vmul.f32 0.2, %v115_v38  ;;  %vm118_vm1 = vcmp.gt.f32.partialorder %v115_v38, 0.0 }
  0x9d   :  { %v120_v40 = vsel %vm118_vm1, %v115_v38, %v119_v39 }
  0x9e   :  { %v121_v41 = vpack.c.bf16 %v120_v40, %v120_v40 }
  0xa0   :  { %v116_v42 = vpop.f32.mrf.mxu0  ;;  %v123_v43 = vunpack.c.l.b16 %v121_v41  ;;  %397 = vmatmul.bf16.vlgmr.msra.gmra.mxu1 %v121_v41 }
  0xa2   :  { %v124_v44 = vpack.c.b16 %v123_v43, %v123_v43 }
  0xa4   :  { %v126_v45 = vshrl.u32 %v124_v44, 16  ;;  %v129_v46 = vrot.slane %v124_v44, 1 }
  0xa6   :  { %v131_v47 = vrot.slane %v126_v45, 1  ;;  %410 = vmatmul.bf16.vlgmr.msra.gmra.mxu2 %v126_v45  ;;  %423 = vmatmul.bf16.vlgmr.msra.gmra.mxu3 %v129_v46 }
  0xa8   :  { %436 = vmatmul.bf16.vlgmr.msrb.gmra.mxu0 %v131_v47 }
 0x11d   :  { %v398_v48 = vpop.f32.mrf.mxu1 }
 0x11e   :  { %v399_v52 = vadd.f32 %v398_v48, %v79_v49 }
 0x125   :  { %v400_v50 = vpop.f32.mrf.mxu1  ;;  %v437_v51 = vpop.f32.mrf.mxu0 }
 0x129   :  { %v411_v53 = vpop.f32.mrf.mxu2  ;;  %v424_v54 = vpop.f32.mrf.mxu3 }
 0x12a   :  { %v412_v55 = vadd.f32 %v411_v53, %v399_v52 }
 0x12c   :  { %v425_v56 = vadd.f32 %v424_v54, %v412_v55 }
 0x12d   :  { %v439_v57 = vpop.f32.mrf.mxu0 }
 0x12e   :  { %v438_v58 = vadd.f32 %v437_v51, %v425_v56 }
 0x130   :  { %v442_v59 = vmul.f32 0.2, %v438_v58  ;;  %vm441_vm2 = vcmp.gt.f32.partialorder %v438_v58, 0.0 }
 0x131   :  { %v413_v61 = vpop.f32.mrf.mxu2  ;;  %v426_v62 = vpop.f32.mrf.mxu3 }
 0x132   :  { %v443_v63 = vsel %vm441_vm2, %v438_v58, %v442_v59 }
 0x133   :  { %v444_v0 = vmul.f32 %v443_v63, %v80_v60 }
 0x135   :  { %v446_v1 = vsel %vm445_vm3, %v444_v0, 0.0 }
 0x136   :  { %447 = vadd.xlane.f32.xlu0 %v446_v1 }
 0x1a9   :  { %v448_v3 = vpop.xlane.xlu0 %447 }
 0x1aa   :  { %v449_v4 = vadd.f32 %v448_v3, %v81_v2 }
 0x1ac   :  { %v450_v5 = vand.u32 2147483647, %v449_v4  ;;  %vm456_vm5 = vcmp.ge.f32.partialorder %v449_v4, 0.0 }
 0x1ae   :  { %v451_v6 = vsub.f32 0.0, %v450_v5 }
 0x1b0   :  { %v452_v7 = vmul.f32 1.442695, %v451_v6 }
 0x1b2   :  { %659 = vpow2.f32 %v452_v7 }
 0x1b8   :  { %v660_v8 = vpop.eup %659 }
 0x1b9   :  { %v454_v9 = vadd.f32 1.0, %v660_v8 }
 0x1bb   :  { %661 = vrcp.f32 %v454_v9 }
 0x1c1   :  { %v662_v10 = vpop.eup %661 }
 0x1c2   :  { %v457_v11 = vsub.f32 1.0, %v662_v10 }
 0x1c4   :  { %v458_v12 = vsel %vm456_vm5, %v662_v10, %v457_v11 }
 0x1c5   :  { %460 = vst.msk [vmem:[#allocation10] sm:$0x1] %vm459_vm4, %v458_v12 }
 0x1c6   :  { %471 = dma.vmem_to_hbm [thread:$0]  %s467_s3, 16, %s469_s11, [#allocation4]  }
 0x1c7   :  { %789 = dma.done.wait [#allocation4], 16  }
 0x1c8   :  { %790 = vsyncadd [#allocation4], 4294967280 }
 0x1c9   :  { %476 = vsyncpa [#allocation3], 1 }
 0x1ca   :  { %477 = vsyncpa [#allocation6], 1 }
 0x1cb   :  { %478 = vsyncpa [#allocation9], 1 }
 0x1cc   :  { %479 = vsyncpa [#allocation4], 1 }

</bundles_post_ra>
